<compile_context>
chip_gen: v7x
topology: tpu7x:2x2x1
jax: 0.10.0
libtpu: 0.0.40
codegen_flags: <defaults>
</compile_context>

<pallas_src>
import math
import functools

import jax
import jax.numpy as jnp
from jax.experimental import pallas as pl
from jax.experimental.pallas import tpu as pltpu


# ----------------------------------------------------------------------------
# Kernel helpers
# ----------------------------------------------------------------------------
def _dot(a, b, *, contract_rhs_last=False):
    """2-D MXU matmul with f32 accumulation.

    contract_rhs_last=True contracts b's last dim (i.e. a @ b.T) without
    materializing a transpose."""
    bd = 1 if contract_rhs_last else 0
    return jax.lax.dot_general(
        a, b,
        dimension_numbers=(((1,), (bd,)), ((), ())),
        preferred_element_type=jnp.float32)


def _attention_core(q, k_s, v_s, attn_s, *, num_heads, mm_dtype, exact_recip):
    """Per-head softmax attention.

    q       : (TQ, E) value, already mm_dtype (scale folded into Wq).
    k_s/v_s : VMEM scratch refs (Lk, E), mm_dtype (projected keys / values).
    attn_s  : VMEM scratch ref (TQ, E), f32 -- merged per-head outputs land
              here so the output projection is a single K=E matmul."""
    E = q.shape[1]
    Dh = E // num_heads
    for h in range(num_heads):
        lo, hi = h * Dh, (h + 1) * Dh
        # TODO(synk): when Dh % 128 != 0, zero-pad each head to 128 lanes in
        # the host weight layout so these column slices stay lane-aligned.
        qh = q[:, lo:hi]                                  # (TQ, Dh)
        kh = k_s[:, lo:hi]                                # (Lk, Dh)
        vh = v_s[:, lo:hi]                                # (Lk, Dh)

        s = _dot(qh, kh, contract_rhs_last=True)          # (TQ, Lk) f32
        m = jnp.max(s, axis=-1, keepdims=True)
        # TODO(synk): if the single EUP slot binds on v6e/v7x, do this exp
        # in bf16 (keep max/sum/accumulation in f32).
        p = jnp.exp(s - m)                                # unnormalized probs
        l = jnp.sum(p, axis=-1, keepdims=True)            # (TQ, 1) f32
        ah = _dot(p.astype(mm_dtype), vh)                 # (TQ, Dh) f32
        # Deferred softmax normalization: scale the (TQ, Dh) output tile
        # instead of the (TQ, Lk) score tile (Lk/Dh less VALU work).
        inv = pl.reciprocal(l, approx=not exact_recip)
        attn_s[:, lo:hi] = ah * inv


def _finalize(attn_s, wo_ref, bo_ref, o_ref, mm_dtype):
    # Single K=E output projection over the merged heads (full MXU depth),
    # f32 bias add, lane-dense store of the whole (TQ, E) output block.
    out = _dot(attn_s[...].astype(mm_dtype), wo_ref[...]) + bo_ref[...]
    o_ref[0] = out.astype(o_ref.dtype)


# ----------------------------------------------------------------------------
# Kernels
# ----------------------------------------------------------------------------
def _mha_self_kernel(x_ref, wqkv_ref, bqkv_ref, wo_ref, bo_ref, o_ref,
                     q_s, k_s, v_s, attn_s,
                     *, num_heads, mm_dtype, exact_recip):
    """Self-attention fast path: one activation input, one fused projection."""
    qi = pl.program_id(1)
    L = x_ref.shape[1]
    E = x_ref.shape[2]
    TQ = o_ref.shape[1]

    # Project q|k|v for the whole sequence ONCE per batch element (qi axis is
    # "arbitrary" = sequential, so scratch persists across it) with a single
    # fused (L, E) @ (E, 3E) MXU call.
    @pl.when(qi == 0)
    def _():
        x = x_ref[0].astype(mm_dtype)                                # (L, E)
        qkv = _dot(x, wqkv_ref[...]) + bqkv_ref[...]                 # (L, 3E) f32
        q_s[0:L, :] = qkv[:, 0:E]
        k_s[...] = qkv[:, E:2 * E].astype(k_s.dtype)
        v_s[...] = qkv[:, 2 * E:3 * E].astype(v_s.dtype)

    start = pl.multiple_of(qi * TQ, TQ)
    q = q_s[pl.ds(start, TQ), :].astype(mm_dtype)                    # (TQ, E)
    _attention_core(q, k_s, v_s, attn_s, num_heads=num_heads,
                    mm_dtype=mm_dtype, exact_recip=exact_recip)
    _finalize(attn_s, wo_ref, bo_ref, o_ref, mm_dtype)


def _mha_cross_kernel(xq_ref, xk_ref, xv_ref, wqkv_ref, bqkv_ref, wo_ref,
                      bo_ref, o_ref, k_s, v_s, attn_s,
                      *, num_heads, mm_dtype, exact_recip):
    """General path: distinct query / key / value sources."""
    qi = pl.program_id(1)
    E = xq_ref.shape[2]

    # Project full keys / values ONCE per batch element into VMEM scratch;
    # every query tile of this batch element reuses them.
    @pl.when(qi == 0)
    def _():
        xk = xk_ref[0].astype(mm_dtype)
        xv = xv_ref[0].astype(mm_dtype)
        k = _dot(xk, wqkv_ref[:, E:2 * E]) + bqkv_ref[:, E:2 * E]
        v = _dot(xv, wqkv_ref[:, 2 * E:3 * E]) + bqkv_ref[:, 2 * E:3 * E]
        k_s[...] = k.astype(k_s.dtype)
        v_s[...] = v.astype(v_s.dtype)

    # Per-tile query projection (1/sqrt(Dh) already folded into the weights).
    xq = xq_ref[0].astype(mm_dtype)                                  # (TQ, E)
    q = (_dot(xq, wqkv_ref[:, 0:E]) + bqkv_ref[:, 0:E]).astype(mm_dtype)
    _attention_core(q, k_s, v_s, attn_s, num_heads=num_heads,
                    mm_dtype=mm_dtype, exact_recip=exact_recip)
    _finalize(attn_s, wo_ref, bo_ref, o_ref, mm_dtype)


# ----------------------------------------------------------------------------
# Wrapper
# ----------------------------------------------------------------------------
def multi_head_attention(query, key, value, params, num_heads,
                         *, use_bf16_matmul=True, q_tile=256):
    """nn.MultiheadAttention(embed_dim, num_heads, batch_first=True) forward,
    returning only attn_output.  query/key/value: (B, L, E).

    use_bf16_matmul=True feeds bf16 operands to the MXU with f32 accumulation
    and f32 softmax (recommended on v5e/v6e/v7x; v5e's MXU is natively bf16).
    The f32 path (use_bf16_matmul=False) additionally uses an exact softmax
    reciprocal."""
    B, Lq, E = query.shape
    Lk = key.shape[1]
    if E % num_heads != 0:
        raise ValueError(f"embed_dim={E} not divisible by num_heads={num_heads}")
    Dh = E // num_heads
    scale = 1.0 / math.sqrt(Dh)

    wq, wk, wv = jnp.split(params["in_proj_weight"], 3, axis=0)   # (E, E) each
    bq, bk, bv = jnp.split(params["in_proj_bias"], 3)             # (E,) each

    mm_dtype = jnp.bfloat16 if use_bf16_matmul else jnp.float32
    exact_recip = not use_bf16_matmul

    # One-time host-side weight prep: transpose to (in, out) layout, fold
    # 1/sqrt(Dh) into the Q projection, concatenate Q|K|V into one (E, 3E)
    # weight so the projection is a single MXU call, and pre-cast the weights
    # to the MXU operand dtype (halves weight DMA + VMEM and removes
    # grid-invariant per-step casts).  Biases stay f32.
    w_qkv = jnp.concatenate([wq.T * scale, wk.T, wv.T], axis=1).astype(mm_dtype)
    b_qkv = jnp.concatenate([bq * scale, bk, bv]).reshape(1, 3 * E).astype(jnp.float32)
    w_out = params["out_proj_weight"].T.astype(mm_dtype)          # (E, E)
    b_out = params["out_proj_bias"].reshape(1, E).astype(jnp.float32)

    self_attn = (query is key) and (key is value)

    # Query tiling: grid = (B, ceil(Lq/TQ)).  K/V stay resident in scratch
    # across the sequential qi axis.
    TQ = min(Lq, q_tile)
    nq = pl.cdiv(Lq, TQ)
    Lq_pad = nq * TQ

    def _w_spec(arr):
        # Grid-invariant blocks: DMA'd once, resident for the whole call.
        return pl.BlockSpec(arr.shape, lambda b, qi: (0, 0))

    # Scoped-VMEM budget computed from the actual resident set (+50%),
    # clamped to [32 MiB, 64 MiB] so it is valid on every chip incl. v7x.
    f32b = 4
    w_isz = jnp.dtype(mm_dtype).itemsize
    in_isz = query.dtype.itemsize
    w_b = (E * 3 * E + E * E) * w_isz + 4 * E * f32b
    if self_attn:
        act_b = Lq * E * in_isz
        scratch_b = (Lq_pad * E + TQ * E) * f32b + 2 * Lk * E * w_isz
        tmp_b = Lq * 3 * E * f32b
    else:
        act_b = (TQ + 2 * Lk) * E * in_isz
        scratch_b = TQ * E * f32b + 2 * Lk * E * w_isz
        tmp_b = TQ * E * f32b
    out_b = TQ * E * in_isz
    score_b = 2 * TQ * Lk * f32b
    est = 2 * (w_b + act_b + out_b) + scratch_b + tmp_b + score_b
    vmem_limit = int(min(64 * 2 ** 20, max(32 * 2 ** 20, 1.5 * est)))

    compiler_params = pltpu.CompilerParams(
        # Batch axis is independent (megacore-shardable); the qi axis must
        # stay sequential because the K/V scratch is filled at qi == 0.
        dimension_semantics=("parallel", "arbitrary"),
        vmem_limit_bytes=vmem_limit,
    )
    out_shape = jax.ShapeDtypeStruct((B, Lq, E), query.dtype)
    out_spec = pl.BlockSpec((1, TQ, E), lambda b, qi: (b, qi, 0))

    if self_attn:
        kernel = functools.partial(
            _mha_self_kernel, num_heads=num_heads, mm_dtype=mm_dtype,
            exact_recip=exact_recip)
        return pl.pallas_call(
            kernel,
            out_shape=out_shape,
            grid=(B, nq),
            in_specs=[
                pl.BlockSpec((1, Lq, E), lambda b, qi: (b, 0, 0)),  # x (once)
                _w_spec(w_qkv), _w_spec(b_qkv), _w_spec(w_out), _w_spec(b_out),
            ],
            out_specs=out_spec,
            scratch_shapes=[
                pltpu.VMEM((Lq_pad, E), jnp.float32),   # projected q (padded rows)
                pltpu.VMEM((Lk, E), mm_dtype),          # projected k
                pltpu.VMEM((Lk, E), mm_dtype),          # projected v
                pltpu.VMEM((TQ, E), jnp.float32),       # merged head outputs
            ],
            compiler_params=compiler_params,
        )(query, w_qkv, b_qkv, w_out, b_out)

    kernel = functools.partial(
        _mha_cross_kernel, num_heads=num_heads, mm_dtype=mm_dtype,
        exact_recip=exact_recip)
    return pl.pallas_call(
        kernel,
        out_shape=out_shape,
        grid=(B, nq),
        in_specs=[
            pl.BlockSpec((1, TQ, E), lambda b, qi: (b, qi, 0)),     # query tile
            pl.BlockSpec((1, Lk, E), lambda b, qi: (b, 0, 0)),      # key (once / b)
            pl.BlockSpec((1, Lk, E), lambda b, qi: (b, 0, 0)),      # value (once / b)
            _w_spec(w_qkv), _w_spec(b_qkv), _w_spec(w_out), _w_spec(b_out),
        ],
        out_specs=out_spec,
        scratch_shapes=[
            pltpu.VMEM((Lk, E), mm_dtype),              # projected k
            pltpu.VMEM((Lk, E), mm_dtype),              # projected v
            pltpu.VMEM((TQ, E), jnp.float32),           # merged head outputs
        ],
        compiler_params=compiler_params,
    )(query, key, value, w_qkv, b_qkv, w_out, b_out)


# ----------------------------------------------------------------------------
# Pure-JAX reference for verification.
# ----------------------------------------------------------------------------
def _reference(query, key, value, params, num_heads):
    B, Lq, E = query.shape
    Lk = key.shape[1]
    Dh = E // num_heads
    wq, wk, wv = jnp.split(params["in_proj_weight"], 3, axis=0)
    bq, bk, bv = jnp.split(params["in_proj_bias"], 3)
    q = query @ wq.T + bq
    k = key @ wk.T + bk
    v = value @ wv.T + bv
    q = q.reshape(B, Lq, num_heads, Dh).transpose(0, 2, 1, 3)
    k = k.reshape(B, Lk, num_heads, Dh).transpose(0, 2, 1, 3)
    v = v.reshape(B, Lk, num_heads, Dh).transpose(0, 2, 1, 3)
    s = jnp.einsum("bhqd,bhkd->bhqk", q, k) / math.sqrt(Dh)
    p = jax.nn.softmax(s, axis=-1)
    o = jnp.einsum("bhqk,bhkd->bhqd", p, v)
    o = o.transpose(0, 2, 1, 3).reshape(B, Lq, E)
    return o @ params["out_proj_weight"].T + params["out_proj_bias"]


if __name__ == "__main__":
    B, L, E, H = 2, 8, 32, 4  # batch, seq, embed_dim, num_heads

    key0 = jax.random.PRNGKey(0)
    k_q, k_k, k_v, k_wi, k_bi, k_wo, k_bo = jax.random.split(key0, 7)

    query = jax.random.normal(k_q, (B, L, E), dtype=jnp.float32)
    key_t = jax.random.normal(k_k, (B, L, E), dtype=jnp.float32)
    value = jax.random.normal(k_v, (B, L, E), dtype=jnp.float32)

    # Deterministic parameters (shapes match nn.MultiheadAttention(E, H)).
    params = {
        "in_proj_weight": 0.1 * jax.random.normal(k_wi, (3 * E, E), jnp.float32),
        "in_proj_bias": 0.1 * jax.random.normal(k_bi, (3 * E,), jnp.float32),
        "out_proj_weight": 0.1 * jax.random.normal(k_wo, (E, E), jnp.float32),
        "out_proj_bias": 0.1 * jax.random.normal(k_bo, (E,), jnp.float32),
    }

    ref = _reference(query, key_t, value, params, H)

    # Exact-arithmetic path (f32 MXU operands, exact softmax reciprocal).
    out_f32 = multi_head_attention(query, key_t, value, params, H,
                                   use_bf16_matmul=False)
    out_f32 = jax.block_until_ready(out_f32)
    assert out_f32.shape == (B, L, E)
    assert jnp.allclose(out_f32, ref, rtol=1e-3, atol=1e-3), "f32 path mismatch"

    # Default bf16-operand MXU path (f32 accumulation / f32 softmax).
    out_bf16 = multi_head_attention(query, key_t, value, params, H)
    out_bf16 = jax.block_until_ready(out_bf16)
    assert jnp.allclose(out_bf16, ref, rtol=5e-2, atol=5e-2), "bf16 path mismatch"

    # Fused self-attention fast path (activation passed once, single fused
    # (L, E) @ (E, 3E) projection).
    ref_self = _reference(query, query, query, params, H)
    out_self = multi_head_attention(query, query, query, params, H,
                                    use_bf16_matmul=False)
    out_self = jax.block_until_ready(out_self)
    assert out_self.shape == (B, L, E)
    assert jnp.allclose(out_self, ref_self, rtol=1e-3, atol=1e-3), \
        "self-attention path mismatch"

    print("KERNEL_OK")
</pallas_src>

<mosaic_0001>
module attributes {stable_mosaic.version = 11 : i64} {
  func.func @_mha_cross_kernel(%arg0: i32, %arg1: i32, %arg2: memref<1x8x32xf32, #tpu.memory_space<vmem>>, %arg3: memref<1x8x32xf32, #tpu.memory_space<vmem>>, %arg4: memref<1x8x32xf32, #tpu.memory_space<vmem>>, %arg5: memref<32x96xf32, #tpu.memory_space<vmem>>, %arg6: memref<1x96xf32, #tpu.memory_space<vmem>>, %arg7: memref<32x32xf32, #tpu.memory_space<vmem>>, %arg8: memref<1x32xf32, #tpu.memory_space<vmem>>, %arg9: memref<1x8x32xf32, #tpu.memory_space<vmem>>, %arg10: memref<8x32xf32, #tpu.memory_space<vmem>>, %arg11: memref<8x32xf32, #tpu.memory_space<vmem>>, %arg12: memref<8x32xf32, #tpu.memory_space<vmem>>) attributes {dimension_semantics = [#tpu.dimension_semantics<parallel>, #tpu.dimension_semantics<arbitrary>], iteration_bounds = array<i64: 2, 1>, scalar_prefetch = 0 : i64, scratch_operands = 3 : i64, tpu.core_type = #tpu.core_type<tc>, window_params = [{transform_indices = @transform_0, window_bounds = array<i64: 1, 8, 32>}, {transform_indices = @transform_1, window_bounds = array<i64: 1, 8, 32>}, {transform_indices = @transform_2, window_bounds = array<i64: 1, 8, 32>}, {pipeline_mode = #tpu.pipeline_mode<synchronous>, transform_indices = @transform_3, window_bounds = array<i64: 32, 96>}, {pipeline_mode = #tpu.pipeline_mode<synchronous>, transform_indices = @transform_4, window_bounds = array<i64: 1, 96>}, {pipeline_mode = #tpu.pipeline_mode<synchronous>, transform_indices = @transform_5, window_bounds = array<i64: 32, 32>}, {pipeline_mode = #tpu.pipeline_mode<synchronous>, transform_indices = @transform_6, window_bounds = array<i64: 1, 32>}, {transform_indices = @transform_7, window_bounds = array<i64: 1, 8, 32>}]} {
    %c0_i32 = arith.constant 0 : i32
    %0 = arith.cmpi eq, %arg1, %c0_i32 : i32
    %1 = arith.extui %0 : i1 to i32
    %c0_i32_0 = arith.constant 0 : i32
    %2 = arith.cmpi ne, %1, %c0_i32_0 : i32
    scf.if %2 {
      %c0_54 = arith.constant 0 : index
      %c0_55 = arith.constant 0 : index
      %c0_56 = arith.constant 0 : index
      %83 = vector.load %arg3[%c0_54, %c0_55, %c0_56] : memref<1x8x32xf32, #tpu.memory_space<vmem>>, vector<1x8x32xf32>
      %84 = vector.shape_cast %83 : vector<1x8x32xf32> to vector<8x32xf32>
      %c0_57 = arith.constant 0 : index
      %c0_58 = arith.constant 0 : index
      %c0_59 = arith.constant 0 : index
      %85 = vector.load %arg4[%c0_57, %c0_58, %c0_59] : memref<1x8x32xf32, #tpu.memory_space<vmem>>, vector<1x8x32xf32>
      %86 = vector.shape_cast %85 : vector<1x8x32xf32> to vector<8x32xf32>
      %c0_60 = arith.constant 0 : index
      %c32 = arith.constant 32 : index
      %87 = vector.load %arg5[%c0_60, %c32] : memref<32x96xf32, #tpu.memory_space<vmem>>, vector<32x32xf32>
      %cst_61 = arith.constant dense<0.000000e+00> : vector<8x32xf32>
      %88 = tpu.matmul %84, %87, %cst_61 {dimension_numbers = #tpu.dot_dimension_numbers<[1], [0], [0], [1], [0, 0, 1, 1], [], []>} : vector<8x32xf32>, vector<32x32xf32>, vector<8x32xf32> -> vector<8x32xf32>
      %c0_62 = arith.constant 0 : index
      %c32_63 = arith.constant 32 : index
      %89 = vector.load %arg6[%c0_62, %c32_63] : memref<1x96xf32, #tpu.memory_space<vmem>>, vector<1x32xf32>
      %90 = vector.broadcast %89 : vector<1x32xf32> to vector<8x32xf32>
      %91 = arith.addf %88, %90 : vector<8x32xf32>
      %c0_64 = arith.constant 0 : index
      %c64 = arith.constant 64 : index
      %92 = vector.load %arg5[%c0_64, %c64] : memref<32x96xf32, #tpu.memory_space<vmem>>, vector<32x32xf32>
      %cst_65 = arith.constant dense<0.000000e+00> : vector<8x32xf32>
      %93 = tpu.matmul %86, %92, %cst_65 {dimension_numbers = #tpu.dot_dimension_numbers<[1], [0], [0], [1], [0, 0, 1, 1], [], []>} : vector<8x32xf32>, vector<32x32xf32>, vector<8x32xf32> -> vector<8x32xf32>
      %c0_66 = arith.constant 0 : index
      %c64_67 = arith.constant 64 : index
      %94 = vector.load %arg6[%c0_66, %c64_67] : memref<1x96xf32, #tpu.memory_space<vmem>>, vector<1x32xf32>
      %95 = vector.broadcast %94 : vector<1x32xf32> to vector<8x32xf32>
      %96 = arith.addf %93, %95 : vector<8x32xf32>
      %c0_68 = arith.constant 0 : index
      %c0_69 = arith.constant 0 : index
      %97 = vector.load %arg10[%c0_68, %c0_69] : memref<8x32xf32, #tpu.memory_space<vmem>>, vector<8x32xf32>
      tpu.vector_store %arg10[%c0_68, %c0_69], %91 {strides = array<i32>} : memref<8x32xf32, #tpu.memory_space<vmem>>, vector<8x32xf32>,
      %c0_70 = arith.constant 0 : index
      %c0_71 = arith.constant 0 : index
      %98 = vector.load %arg11[%c0_70, %c0_71] : memref<8x32xf32, #tpu.memory_space<vmem>>, vector<8x32xf32>
      tpu.vector_store %arg11[%c0_70, %c0_71], %96 {strides = array<i32>} : memref<8x32xf32, #tpu.memory_space<vmem>>, vector<8x32xf32>,
    } else {
    }
    %c0 = arith.constant 0 : index
    %c0_1 = arith.constant 0 : index
    %c0_2 = arith.constant 0 : index
    %3 = vector.load %arg2[%c0, %c0_1, %c0_2] : memref<1x8x32xf32, #tpu.memory_space<vmem>>, vector<1x8x32xf32>
    %4 = vector.shape_cast %3 : vector<1x8x32xf32> to vector<8x32xf32>
    %c0_3 = arith.constant 0 : index
    %c0_4 = arith.constant 0 : index
    %5 = vector.load %arg5[%c0_3, %c0_4] : memref<32x96xf32, #tpu.memory_space<vmem>>, vector<32x32xf32>
    %cst = arith.constant dense<0.000000e+00> : vector<8x32xf32>
    %6 = tpu.matmul %4, %5, %cst {dimension_numbers = #tpu.dot_dimension_numbers<[1], [0], [0], [1], [0, 0, 1, 1], [], []>} : vector<8x32xf32>, vector<32x32xf32>, vector<8x32xf32> -> vector<8x32xf32>
    %c0_5 = arith.constant 0 : index
    %c0_6 = arith.constant 0 : index
    %7 = vector.load %arg6[%c0_5, %c0_6] : memref<1x96xf32, #tpu.memory_space<vmem>>, vector<1x32xf32>
    %8 = vector.broadcast %7 : vector<1x32xf32> to vector<8x32xf32>
    %9 = arith.addf %6, %8 : vector<8x32xf32>
    %10 = vector.extract_strided_slice %9 {offsets = [0, 0], sizes = [8, 8], strides = [1, 1]} : vector<8x32xf32> to vector<8x8xf32>
    %c0_7 = arith.constant 0 : index
    %c0_8 = arith.constant 0 : index
    %11 = vector.load %arg10[%c0_7, %c0_8] : memref<8x32xf32, #tpu.memory_space<vmem>>, vector<8x8xf32>
    %c0_9 = arith.constant 0 : index
    %c0_10 = arith.constant 0 : index
    %12 = vector.load %arg11[%c0_9, %c0_10] : memref<8x32xf32, #tpu.memory_space<vmem>>, vector<8x8xf32>
    %cst_11 = arith.constant dense<0.000000e+00> : vector<8x8xf32>
    %13 = tpu.matmul %10, %11, %cst_11 {dimension_numbers = #tpu.dot_dimension_numbers<[1], [1], [0], [0], [0, 0, 1, 0], [], []>} : vector<8x8xf32>, vector<8x8xf32>, vector<8x8xf32> -> vector<8x8xf32>
    %cst_12 = arith.constant dense<0xFF800000> : vector<8xf32>
    %14 = vector.multi_reduction <maximumf>, %13, %cst_12 [1] : vector<8x8xf32> to vector<8xf32>
    %15 = vector.shape_cast %14 : vector<8xf32> to vector<8x1xf32>
    %16 = vector.broadcast %15 : vector<8x1xf32> to vector<8x8xf32>
    %17 = arith.subf %13, %16 : vector<8x8xf32>
    %18 = math.exp %17 : vector<8x8xf32>
    %cst_13 = arith.constant dense<0.000000e+00> : vector<8xf32>
    %19 = vector.multi_reduction <add>, %18, %cst_13 [1] : vector<8x8xf32> to vector<8xf32>
    %20 = vector.shape_cast %19 : vector<8xf32> to vector<8x1xf32>
    %cst_14 = arith.constant dense<0.000000e+00> : vector<8x8xf32>
    %21 = tpu.matmul %18, %12, %cst_14 {dimension_numbers = #tpu.dot_dimension_numbers<[1], [0], [0], [1], [0, 0, 1, 1], [], []>} : vector<8x8xf32>, vector<8x8xf32>, vector<8x8xf32> -> vector<8x8xf32>
    %22 = tpu.reciprocal %20 : vector<8x1xf32> -> vector<8x1xf32>
    %23 = vector.broadcast %22 : vector<8x1xf32> to vector<8x8xf32>
    %24 = arith.mulf %21, %23 : vector<8x8xf32>
    %c0_15 = arith.constant 0 : index
    %c0_16 = arith.constant 0 : index
    %25 = vector.load %arg12[%c0_15, %c0_16] : memref<8x32xf32, #tpu.memory_space<vmem>>, vector<8x8xf32>
    tpu.vector_store %arg12[%c0_15, %c0_16], %24 {strides = array<i32>} : memref<8x32xf32, #tpu.memory_space<vmem>>, vector<8x8xf32>,
    %26 = vector.extract_strided_slice %9 {offsets = [0, 8], sizes = [8, 8], strides = [1, 1]} : vector<8x32xf32> to vector<8x8xf32>
    %c0_17 = arith.constant 0 : index
    %c8 = arith.constant 8 : index
    %27 = vector.load %arg10[%c0_17, %c8] : memref<8x32xf32, #tpu.memory_space<vmem>>, vector<8x8xf32>
    %c0_18 = arith.constant 0 : index
    %c8_19 = arith.constant 8 : index
    %28 = vector.load %arg11[%c0_18, %c8_19] : memref<8x32xf32, #tpu.memory_space<vmem>>, vector<8x8xf32>
    %cst_20 = arith.constant dense<0.000000e+00> : vector<8x8xf32>
    %29 = tpu.matmul %26, %27, %cst_20 {dimension_numbers = #tpu.dot_dimension_numbers<[1], [1], [0], [0], [0, 0, 1, 0], [], []>} : vector<8x8xf32>, vector<8x8xf32>, vector<8x8xf32> -> vector<8x8xf32>
    %cst_21 = arith.constant dense<0xFF800000> : vector<8xf32>
    %30 = vector.multi_reduction <maximumf>, %29, %cst_21 [1] : vector<8x8xf32> to vector<8xf32>
    %31 = vector.shape_cast %30 : vector<8xf32> to vector<8x1xf32>
    %32 = vector.broadcast %31 : vector<8x1xf32> to vector<8x8xf32>
    %33 = arith.subf %29, %32 : vector<8x8xf32>
    %34 = math.exp %33 : vector<8x8xf32>
    %cst_22 = arith.constant dense<0.000000e+00> : vector<8xf32>
    %35 = vector.multi_reduction <add>, %34, %cst_22 [1] : vector<8x8xf32> to vector<8xf32>
    %36 = vector.shape_cast %35 : vector<8xf32> to vector<8x1xf32>
    %cst_23 = arith.constant dense<0.000000e+00> : vector<8x8xf32>
    %37 = tpu.matmul %34, %28, %cst_23 {dimension_numbers = #tpu.dot_dimension_numbers<[1], [0], [0], [1], [0, 0, 1, 1], [], []>} : vector<8x8xf32>, vector<8x8xf32>, vector<8x8xf32> -> vector<8x8xf32>
    %38 = tpu.reciprocal %36 : vector<8x1xf32> -> vector<8x1xf32>
    %39 = vector.broadcast %38 : vector<8x1xf32> to vector<8x8xf32>
    %40 = arith.mulf %37, %39 : vector<8x8xf32>
    %c0_24 = arith.constant 0 : index
    %c8_25 = arith.constant 8 : index
    %41 = vector.load %arg12[%c0_24, %c8_25] : memref<8x32xf32, #tpu.memory_space<vmem>>, vector<8x8xf32>
    tpu.vector_store %arg12[%c0_24, %c8_25], %40 {strides = array<i32>} : memref<8x32xf32, #tpu.memory_space<vmem>>, vector<8x8xf32>,
    %42 = vector.extract_strided_slice %9 {offsets = [0, 16], sizes = [8, 8], strides = [1, 1]} : vector<8x32xf32> to vector<8x8xf32>
    %c0_26 = arith.constant 0 : index
    %c16 = arith.constant 16 : index
    %43 = vector.load %arg10[%c0_26, %c16] : memref<8x32xf32, #tpu.memory_space<vmem>>, vector<8x8xf32>
    %c0_27 = arith.constant 0 : index
    %c16_28 = arith.constant 16 : index
    %44 = vector.load %arg11[%c0_27, %c16_28] : memref<8x32xf32, #tpu.memory_space<vmem>>, vector<8x8xf32>
    %cst_29 = arith.constant dense<0.000000e+00> : vector<8x8xf32>
    %45 = tpu.matmul %42, %43, %cst_29 {dimension_numbers = #tpu.dot_dimension_numbers<[1], [1], [0], [0], [0, 0, 1, 0], [], []>} : vector<8x8xf32>, vector<8x8xf32>, vector<8x8xf32> -> vector<8x8xf32>
    %cst_30 = arith.constant dense<0xFF800000> : vector<8xf32>
    %46 = vector.multi_reduction <maximumf>, %45, %cst_30 [1] : vector<8x8xf32> to vector<8xf32>
    %47 = vector.shape_cast %46 : vector<8xf32> to vector<8x1xf32>
    %48 = vector.broadcast %47 : vector<8x1xf32> to vector<8x8xf32>
    %49 = arith.subf %45, %48 : vector<8x8xf32>
    %50 = math.exp %49 : vector<8x8xf32>
    %cst_31 = arith.constant dense<0.000000e+00> : vector<8xf32>
    %51 = vector.multi_reduction <add>, %50, %cst_31 [1] : vector<8x8xf32> to vector<8xf32>
    %52 = vector.shape_cast %51 : vector<8xf32> to vector<8x1xf32>
    %cst_32 = arith.constant dense<0.000000e+00> : vector<8x8xf32>
    %53 = tpu.matmul %50, %44, %cst_32 {dimension_numbers = #tpu.dot_dimension_numbers<[1], [0], [0], [1], [0, 0, 1, 1], [], []>} : vector<8x8xf32>, vector<8x8xf32>, vector<8x8xf32> -> vector<8x8xf32>
    %54 = tpu.reciprocal %52 : vector<8x1xf32> -> vector<8x1xf32>
    %55 = vector.broadcast %54 : vector<8x1xf32> to vector<8x8xf32>
    %56 = arith.mulf %53, %55 : vector<8x8xf32>
    %c0_33 = arith.constant 0 : index
    %c16_34 = arith.constant 16 : index
    %57 = vector.load %arg12[%c0_33, %c16_34] : memref<8x32xf32, #tpu.memory_space<vmem>>, vector<8x8xf32>
    tpu.vector_store %arg12[%c0_33, %c16_34], %56 {strides = array<i32>} : memref<8x32xf32, #tpu.memory_space<vmem>>, vector<8x8xf32>,
    %58 = vector.extract_strided_slice %9 {offsets = [0, 24], sizes = [8, 8], strides = [1, 1]} : vector<8x32xf32> to vector<8x8xf32>
    %c0_35 = arith.constant 0 : index
    %c24 = arith.constant 24 : index
    %59 = vector.load %arg10[%c0_35, %c24] : memref<8x32xf32, #tpu.memory_space<vmem>>, vector<8x8xf32>
    %c0_36 = arith.constant 0 : index
    %c24_37 = arith.constant 24 : index
    %60 = vector.load %arg11[%c0_36, %c24_37] : memref<8x32xf32, #tpu.memory_space<vmem>>, vector<8x8xf32>
    %cst_38 = arith.constant dense<0.000000e+00> : vector<8x8xf32>
    %61 = tpu.matmul %58, %59, %cst_38 {dimension_numbers = #tpu.dot_dimension_numbers<[1], [1], [0], [0], [0, 0, 1, 0], [], []>} : vector<8x8xf32>, vector<8x8xf32>, vector<8x8xf32> -> vector<8x8xf32>
    %cst_39 = arith.constant dense<0xFF800000> : vector<8xf32>
    %62 = vector.multi_reduction <maximumf>, %61, %cst_39 [1] : vector<8x8xf32> to vector<8xf32>
    %63 = vector.shape_cast %62 : vector<8xf32> to vector<8x1xf32>
    %64 = vector.broadcast %63 : vector<8x1xf32> to vector<8x8xf32>
    %65 = arith.subf %61, %64 : vector<8x8xf32>
    %66 = math.exp %65 : vector<8x8xf32>
    %cst_40 = arith.constant dense<0.000000e+00> : vector<8xf32>
    %67 = vector.multi_reduction <add>, %66, %cst_40 [1] : vector<8x8xf32> to vector<8xf32>
    %68 = vector.shape_cast %67 : vector<8xf32> to vector<8x1xf32>
    %cst_41 = arith.constant dense<0.000000e+00> : vector<8x8xf32>
    %69 = tpu.matmul %66, %60, %cst_41 {dimension_numbers = #tpu.dot_dimension_numbers<[1], [0], [0], [1], [0, 0, 1, 1], [], []>} : vector<8x8xf32>, vector<8x8xf32>, vector<8x8xf32> -> vector<8x8xf32>
    %70 = tpu.reciprocal %68 : vector<8x1xf32> -> vector<8x1xf32>
    %71 = vector.broadcast %70 : vector<8x1xf32> to vector<8x8xf32>
    %72 = arith.mulf %69, %71 : vector<8x8xf32>
    %c0_42 = arith.constant 0 : index
    %c24_43 = arith.constant 24 : index
    %73 = vector.load %arg12[%c0_42, %c24_43] : memref<8x32xf32, #tpu.memory_space<vmem>>, vector<8x8xf32>
    tpu.vector_store %arg12[%c0_42, %c24_43], %72 {strides = array<i32>} : memref<8x32xf32, #tpu.memory_space<vmem>>, vector<8x8xf32>,
    %c0_44 = arith.constant 0 : index
    %c0_45 = arith.constant 0 : index
    %74 = vector.load %arg12[%c0_44, %c0_45] : memref<8x32xf32, #tpu.memory_space<vmem>>, vector<8x32xf32>
    %c0_46 = arith.constant 0 : index
    %c0_47 = arith.constant 0 : index
    %75 = vector.load %arg7[%c0_46, %c0_47] : memref<32x32xf32, #tpu.memory_space<vmem>>, vector<32x32xf32>
    %cst_48 = arith.constant dense<0.000000e+00> : vector<8x32xf32>
    %76 = tpu.matmul %74, %75, %cst_48 {dimension_numbers = #tpu.dot_dimension_numbers<[1], [0], [0], [1], [0, 0, 1, 1], [], []>} : vector<8x32xf32>, vector<32x32xf32>, vector<8x32xf32> -> vector<8x32xf32>
    %c0_49 = arith.constant 0 : index
    %c0_50 = arith.constant 0 : index
    %77 = vector.load %arg8[%c0_49, %c0_50] : memref<1x32xf32, #tpu.memory_space<vmem>>, vector<1x32xf32>
    %78 = vector.broadcast %77 : vector<1x32xf32> to vector<8x32xf32>
    %79 = arith.addf %76, %78 : vector<8x32xf32>
    %c0_51 = arith.constant 0 : index
    %c0_52 = arith.constant 0 : index
    %c0_53 = arith.constant 0 : index
    %80 = vector.load %arg9[%c0_51, %c0_52, %c0_53] : memref<1x8x32xf32, #tpu.memory_space<vmem>>, vector<1x8x32xf32>
    %81 = vector.shape_cast %80 : vector<1x8x32xf32> to vector<8x32xf32>
    %82 = vector.shape_cast %79 : vector<8x32xf32> to vector<1x8x32xf32>
    tpu.vector_store %arg9[%c0_51, %c0_52, %c0_53], %82 {strides = array<i32>} : memref<1x8x32xf32, #tpu.memory_space<vmem>>, vector<1x8x32xf32>,
    return
  }
  func.func @transform_0(%arg0: i32, %arg1: i32) -> (i32, i32, i32) {
    %c0_i32 = arith.constant 0 : i32
    %c0_i32_0 = arith.constant 0 : i32
    return %arg0, %arg1, %c0_i32 : i32, i32, i32
  }
  func.func @transform_1(%arg0: i32, %arg1: i32) -> (i32, i32, i32) {
    %c0_i32 = arith.constant 0 : i32
    %c0_i32_0 = arith.constant 0 : i32
    %c0_i32_1 = arith.constant 0 : i32
    return %arg0, %c0_i32, %c0_i32_0 : i32, i32, i32
  }
  func.func @transform_2(%arg0: i32, %arg1: i32) -> (i32, i32, i32) {
    %c0_i32 = arith.constant 0 : i32
    %c0_i32_0 = arith.constant 0 : i32
    %c0_i32_1 = arith.constant 0 : i32
    return %arg0, %c0_i32, %c0_i32_0 : i32, i32, i32
  }
  func.func @transform_3(%arg0: i32, %arg1: i32) -> (i32, i32) {
    %c0_i32 = arith.constant 0 : i32
    %c0_i32_0 = arith.constant 0 : i32
    %c0_i32_1 = arith.constant 0 : i32
    return %c0_i32, %c0_i32_0 : i32, i32
  }
  func.func @transform_4(%arg0: i32, %arg1: i32) -> (i32, i32) {
    %c0_i32 = arith.constant 0 : i32
    %c0_i32_0 = arith.constant 0 : i32
    %c0_i32_1 = arith.constant 0 : i32
    return %c0_i32, %c0_i32_0 : i32, i32
  }
  func.func @transform_5(%arg0: i32, %arg1: i32) -> (i32, i32) {
    %c0_i32 = arith.constant 0 : i32
    %c0_i32_0 = arith.constant 0 : i32
    %c0_i32_1 = arith.constant 0 : i32
    return %c0_i32, %c0_i32_0 : i32, i32
  }
  func.func @transform_6(%arg0: i32, %arg1: i32) -> (i32, i32) {
    %c0_i32 = arith.constant 0 : i32
    %c0_i32_0 = arith.constant 0 : i32
    %c0_i32_1 = arith.constant 0 : i32
    return %c0_i32, %c0_i32_0 : i32, i32
  }
  func.func @transform_7(%arg0: i32, %arg1: i32) -> (i32, i32, i32) {
    %c0_i32 = arith.constant 0 : i32
    %c0_i32_0 = arith.constant 0 : i32
    return %arg0, %arg1, %c0_i32 : i32, i32, i32
  }
}

</mosaic_0001>

<bundles_post_ra>
// kernel: tpu_custom_call.1
= control target key start
LH: loop header
LB: loop body
LE: loop exit
PB: predicated region body
PF: predicated region fallthrough
CT: control target
= control target key end

     0   :  { %s2663_s0 = inlined_call_operand.hbm [shape: f32[2,8,32], index: 0, kind: input, shape index: {}]   ;;  %s2664_s1 = inlined_call_operand.hbm [shape: f32[2,8,32], index: 1, kind: input, shape index: {}]   ;;  %s2665_s2 = inlined_call_operand.hbm [shape: f32[2,8,32], index: 2, kind: input, shape index: {}]   ;;  %s2666_s3 = inlined_call_operand.hbm [shape: f32[32,96], index: 3, kind: input, shape index: {}]   ;;  %s2667_s4 = inlined_call_operand.vmem [shape: f32[1,96], index: 4, kind: input, shape index: {}]   ;;  %s2668_s5 = inlined_call_operand.hbm [shape: f32[32,32], index: 5, kind: input, shape index: {}]   ;;  %s2669_s6 = inlined_call_operand.vmem [shape: f32[1,32], index: 6, kind: input, shape index: {}]   ;;  %s2670_s7 = inlined_call_operand.hbm [shape: f32[2,8,32], index: 7, kind: output, shape index: {}]  }
   0x1   :  { %2690 = sst [smem:[#allocation24_spill]] %s2664_s1 }
   0x2   :  { %2691 = sst [smem:[#allocation25_spill]] %s2666_s3 }
   0x3   :  { %2692 = sst [smem:[#allocation26_spill]] %s2668_s5 }
   0x4   :  { %12 = vsyncpa [#allocation6], 0 }
   0x5   :  { %14 = vsyncpa [#allocation6 + $0x1], 0 }
   0x6   :  { %15 = vsyncpa [#allocation9], 0 }
   0x7   :  { %17 = vsyncpa [#allocation9 + $0x1], 0 }
   0x8   :  { %18 = vsyncpa [#allocation12], 0 }
   0x9   :  { %19 = vsyncpa [#allocation7], 0 }
   0xa   :  { %21 = vsyncpa [#allocation7 + $0x1], 0  ;;  %s2253_s24 = smov 0   ;;  %s2255_s25 = smov 0  }
   0xb   :  { %s2257_s26 = smov 0   ;;  %s2259_s27 = smov 0  }
   0xc   :  { %s2261_s28 = smov 0   ;;  %s2263_s29 = smov 0  }
   0xd LB: > { %2693 = sst [smem:[#allocation19_spill]] %s2188_s28  ;;  %s2284_s30 = sadd.s32 4294967295, %s2192_s29   ;;  %s2192_s29 = sphi %s2263_s29, %s27_s29   ;;  %s2188_s28 = sphi %s2261_s28, %s2729_s28   ;;  %s2184_s27 = sphi %s2259_s27, %s2728_s27   ;;  %s2180_s26 = sphi %s2257_s26, %s2732_s26   ;;  %s2176_s25 = sphi %s2255_s25, %s2731_s25   ;;  %s2172_s24 = sphi %s2253_s24, %s2730_s24  }
   0xe   : > { %2694 = sst [smem:[#allocation20_spill]] %s2192_s29  ;;  %s1629_s8 = sadd.s32 4294967294, %s2192_s29  }
   0xf   : > { %p61_p0 = scmp.ne.s32.totalorder %s2176_s25, %s2172_s24  ;;  %p2671_p1 = scmp.eq.s32.totalorder %s2284_s30, 0 }
  0x10   : > { %p229_p3 = scmp.eq.s32.totalorder %s1629_s8, 1  ;;  %p1630_p5 = scmp.ge.s32.totalorder %s2192_s29, 1 }
  0x11   : > { %p2293_p4 = por %p2671_p1, %p61_p0  ;;  %p236_p7 = scmp.lt.s32.totalorder %s2192_s29, 3 }
  0x12   : > { %p2298_p6 = por %p229_p3, %p61_p0  ;;  %s2194_s12 = smov [#allocation11]  }
  0x13   : > { %s2695_s9 = scalar_select %p2293_p4, 1, 0 }
  0x14   : > { %s2696_s10 = scalar_select %p2298_p6, 1, 0 }
  0x15   : > { %p2303_p8 = pnand %p1630_p5, %p236_p7  ;;  %s248_s13 = sshll.u32 %s2194_s12, 4  ;;  %s249_s13 = int_to_ptr.vmem [resolvable:$true] %s248_s13 }
  0x16   : > { %2697 = sst [smem:[#allocation21_spill]] %s2696_s10  ;;  %s39_s15 = sadd.s32 1, %s2188_s28 }
  0x17   : > { %s2698_s11 = scalar_select %p2303_p8, 1, 0 }
  0x18   : > { %p1830_p9 = pneg %p2303_p8  ;;  %s2700_s3 = sld [smem:[#allocation25_spill]] }
  0x1a   : > { %p2312_p11 = pnand %p1830_p9, %p2671_p1 }
  0x1c   : > { %s2699_s14 = scalar_select %p2312_p11, 1, 0 }
  0x1d   : > { %p2682_p13 = pneg %p2312_p11 }
  0x1e   : > { %s1956_s18 = scalar_lea.hbm %s2700_s3, 512 }
  0x1f   : > { %p1957_p12 = scmp.ne.s32.totalorder %s2700_s3, %s1956_s18  ;;  %p1963_p5 = scmp.lt.u32.totalorder %s1956_s18, %s2700_s3 }
  0x21   : > { %p1959_p0 = pnand %p2682_p13, %p1957_p12 }
  0x23   : > { %p1960_p3 = pneg %p1959_p0 }
  0x25   : > { %p1965_p7 = pnand %p1963_p5, %p1960_p3 }
  0x27   : > { %1968 = shalt.err (!%p1965_p7)
}
  0x28   : > { %s1969_s23 = scalar_lea.vmem %s249_s13, 512  ;;  %p1977_p2 = scmp.lt.s32.totalorder %s249_s13, %s249_s13 }
  0x29   : > { %p1970_p9 = scmp.ne.s32.totalorder %s249_s13, %s1969_s23  ;;  %p1978_p6 = scmp.lt.s32.totalorder %s1969_s23, %s1969_s23 }
  0x2b   : > { %p1972_p10 = pnand %p1970_p9, %p2682_p13  ;;  %p1979_p4 = por %p1978_p6, %p1977_p2 }
  0x2d   : > { %p1973_p1 = pneg %p1972_p10 }
  0x2f   : > { %p1980_p8 = pnand %p1979_p4, %p1973_p1 }
  0x31   : > { %1983 = shalt.err (!%p1980_p8)
}
  0x32   : > { %s2674_s8 = smov 128   ;;  %s2675_s12 = smov 8  }
  0x33   : > { %1833 = dma.hbm_to_vmem [thread:$0]  (!%p2312_p11), %s2700_s3, 512, %s249_s13, [#allocation12], %s2674_s8, %s2674_s8, %s2675_s12  }
  0x34   : > { %p41_p1 = scmp.ge.s32.totalorder %s39_s15, 2  ;;  %s48_s18 = sadd.s32 1, %s2180_s26 }
  0x35   : > { %p55_p2 = scmp.ne.s32.totalorder %s2180_s26, %s2176_s25  ;;  %p56_p4 = scmp.eq.s32.totalorder %s2192_s29, 0 }
  0x36   : > { %s2734_s15 = smov (%p41_p1, %s39_s15), 0  ;;  %p2702_p8 = scmp.eq.s32.totalorder %s2284_s30, 1 }
  0x37   : > { %2701 = sst [smem:[#allocation22_spill]] %s2734_s15  ;;  %p57_p6 = por %p56_p4, %p55_p2 }
  0x38   : > { %p2350_p10 = por %p2702_p8, %p55_p2  ;;  %s43_s20 = ssub.s32 %s2188_s28, %s2734_s15 }
  0x39   : > { %p1853_p12 = scmp.lt.s32.totalorder %s2192_s29, 2  ;;  %p46_p0 = scmp.eq.s32.totalorder %s43_s20, 0 }
  0x3a   : > { %s2703_s19 = scalar_select %p2350_p10, 1, 0 }
  0x3b   : > { %s2676_s21 = sand.u32 1, %s2180_s26   ;;  %s2363_s22 = sshll.u32 %s2188_s28, 7 }
  0x3c   : > { %s2360_s13 = sshll.u32 %s2676_s21, 3  ;;  %p2368_p3 = pnand %p1853_p12, %p57_p6 }
  0x3d   : > { %s2366_s23 = scalar_select %p46_p0, %s2180_s26, %s48_s18  }
  0x3e   : > { %s2705_s16 = scalar_select %p2368_p3, 1, 0 }
  0x3f   : > { %2704 = sst [smem:[#allocation23_spill]] %s2366_s23  ;;  %s300_s17 = sand.u32 1, %s2192_s29  }
  0x40   : > { %s2706_s1 = sld [smem:[#allocation24_spill]]  ;;  %s304_s21 = scalar_lea.vmem [#allocation8], %s2360_s13 }
  0x41   : > { %s311_s3 = sshll.u32 %s304_s21, 4  ;;  %s2197_s18 = smov [#allocation13]   ;;  %s2380_s3 = int_to_ptr.vmem [resolvable:$true] %s311_s3 }
  0x42   : > { %s2382_s15 = sshll.u32 %s2197_s18, 4  ;;  %s2384_s28 = scalar_lea.sflag [#allocation9], %s300_s17  ;;  %s265_s15 = int_to_ptr.vmem [resolvable:$true] %s2382_s15 }
  0x43   : > { %p2390_p7 = pneg %p2368_p3 }
  0x45   : > { %s2707_s8 = scalar_select %p2390_p7, 1, 0 }
  0x46   : > { %s2377_s20 = scalar_lea.hbm %s2706_s1, %s2363_s22  ;;  %s1989_s29 = scalar_lea.hbm %s2706_s1, 256 }
  0x47   : > { %s1984_s23 = scalar_lea.hbm %s2377_s20, 128  ;;  %p1990_p2 = scmp.lt.u32.totalorder %s2377_s20, %s2706_s1 }
  0x48   : > { %p1985_p5 = scmp.ne.s32.totalorder %s2377_s20, %s1984_s23  ;;  %p1991_p4 = scmp.lt.u32.totalorder %s1989_s29, %s1984_s23 }
  0x49   : > { %p1993_p8 = scmp.lt.u32.totalorder %s1984_s23, %s2377_s20 }
  0x4a   : > { %p1987_p9 = pnand %p2390_p7, %p1985_p5  ;;  %p1992_p6 = por %p1991_p4, %p1990_p2 }
  0x4c   : > { %p1988_p1 = pneg %p1987_p9  ;;  %p1994_p12 = por %p1993_p8, %p1992_p6 }
  0x4e   : > { %p1995_p0 = pnand %p1994_p12, %p1988_p1 }
  0x50   : > { %1998 = shalt.err (!%p1995_p0)
}
  0x51   : > { %s1999_s17 = scalar_lea.vmem %s2380_s3, 128  ;;  %s2198_s12 = smov [#allocation8]  }
  0x52   : > { %p2000_p5 = scmp.ne.s32.totalorder %s2380_s3, %s1999_s17  ;;  %s2004_s21 = sshll.u32 %s2198_s12, 4  ;;  %s2005_s21 = int_to_ptr.vmem [resolvable:$false] %s2004_s21 }
  0x53   : > { %s2006_s10 = scalar_lea.vmem %s2005_s21, 256  ;;  %p2007_p10 = scmp.lt.s32.totalorder %s2380_s3, %s2005_s21 }
  0x54   : > { %p2002_p9 = pnand %p2000_p5, %p2390_p7  ;;  %p2008_p11 = scmp.lt.s32.totalorder %s2006_s10, %s1999_s17 }
  0x56   : > { %p2003_p13 = pneg %p2002_p9  ;;  %p2009_p2 = por %p2008_p11, %p2007_p10 }
  0x58   : > { %p2010_p4 = pnand %p2009_p2, %p2003_p13 }
  0x5a   : > { %2013 = shalt.err (!%p2010_p4)
}
  0x5b   : > { %1843 = dma.hbm_to_vmem [thread:$0]  (!%p2368_p3), %s2377_s20, 128, %s2380_s3, %s2384_s28  }
  0x5c   : > { %s2708_s5 = sld [smem:[#allocation26_spill]]  ;;  %p2709_p11 = scmp.ne.s32.totalorder %s2699_s14, 0 }
  0x5e   : > { %p2710_p13 = pneg %p2709_p11 }
  0x62   : > { %s2014_s18 = scalar_lea.hbm %s2708_s5, 512 }
  0x63   : > { %p2015_p1 = scmp.ne.s32.totalorder %s2708_s5, %s2014_s18  ;;  %p2021_p8 = scmp.lt.u32.totalorder %s2014_s18, %s2708_s5 }
  0x65   : > { %p2017_p10 = pnand %p2015_p1, %p2710_p13 }
  0x67   : > { %p2018_p6 = pneg %p2017_p10 }
  0x69   : > { %p2023_p12 = pnand %p2021_p8, %p2018_p6 }
  0x6b   : > { %2026 = shalt.err (!%p2023_p12)
}
  0x6c   : > { %s2027_s3 = scalar_lea.vmem %s265_s15, 512  ;;  %p2711_p5 = pmov %p2710_p13 }
  0x6d   : > { %p2028_p0 = scmp.ne.s32.totalorder %s265_s15, %s2027_s3  ;;  %p2035_p4 = scmp.lt.s32.totalorder %s265_s15, %s265_s15 }
  0x6e   : > { %p2036_p3 = scmp.lt.s32.totalorder %s2027_s3, %s2027_s3 }
  0x6f   : > { %p2030_p9 = pnand %p2028_p0, %p2711_p5 }
  0x70   : > { %p2037_p7 = por %p2036_p3, %p2035_p4 }
  0x71   : > { %p2031_p2 = pneg %p2030_p9 }
  0x73   : > { %p2038_p1 = pnand %p2037_p7, %p2031_p2 }
  0x75   : > { %2041 = shalt.err (!%p2038_p1)
}
  0x76   : > { %s2712_s1 = smov 8   ;;  %s2713_s20 = smov 128  }
  0x77   : > { %1836 = dma.hbm_to_vmem [thread:$0]  (!%p2709_p11), %s2708_s5, 512, %s265_s15, [#allocation12], %s2713_s20, %s2713_s20, %s2712_s1  }
  0x78   : > { %s2442_s12 = scalar_lea.hbm %s2663_s0, %s2363_s22  ;;  %s285_s14 = scalar_lea.vmem [#allocation5], %s2360_s13 }
  0x79   : > { %s293_s17 = sshll.u32 %s285_s14, 4  ;;  %s2451_s10 = scalar_lea.hbm %s2665_s2, %s2363_s22  ;;  %s2445_s17 = int_to_ptr.vmem [resolvable:$true] %s293_s17 }
  0x7a   : > { %s2714_s29 = sand.u32 1, %s2180_s26   ;;  %s2042_s1 = scalar_lea.hbm %s2442_s12, 128 }
  0x7b   : > { %s282_s15 = scalar_lea.sflag [#allocation6], %s2714_s29  ;;  %p2043_p3 = scmp.ne.s32.totalorder %s2442_s12, %s2042_s1 }
  0x7c   : > { %p2715_p7 = scmp.ne.s32.totalorder %s2707_s8, 0  ;;  %s2047_s18 = scalar_lea.hbm %s2663_s0, 256 }
  0x7d   : > { %p2048_p10 = scmp.lt.u32.totalorder %s2442_s12, %s2663_s0  ;;  %p2049_p6 = scmp.lt.u32.totalorder %s2047_s18, %s2042_s1 }
  0x7e   : > { %p2045_p11 = pnand %p2043_p3, %p2715_p7  ;;  %p2051_p12 = scmp.lt.u32.totalorder %s2042_s1, %s2442_s12 }
  0x7f   : > { %p2050_p8 = por %p2049_p6, %p2048_p10 }
  0x80   : > { %p2046_p13 = pneg %p2045_p11 }
  0x81   : > { %p2052_p0 = por %p2051_p12, %p2050_p8 }
  0x83   : > { %p2053_p5 = pnand %p2052_p0, %p2046_p13 }
  0x85   : > { %2056 = shalt.err (!%p2053_p5)
}
  0x86   : > { %s2057_s22 = scalar_lea.vmem %s2445_s17, 128  ;;  %s2199_s21 = smov [#allocation5]  }
  0x87   : > { %p2058_p9 = scmp.ne.s32.totalorder %s2445_s17, %s2057_s22  ;;  %s2062_s3 = sshll.u32 %s2199_s21, 4  ;;  %s2063_s3 = int_to_ptr.vmem [resolvable:$false] %s2062_s3 }
  0x88   : > { %s2064_s5 = scalar_lea.vmem %s2063_s3, 256  ;;  %p2065_p1 = scmp.lt.s32.totalorder %s2445_s17, %s2063_s3 }
  0x89   : > { %p2060_p2 = pnand %p2058_p9, %p2715_p7  ;;  %p2066_p3 = scmp.lt.s32.totalorder %s2064_s5, %s2057_s22 }
  0x8b   : > { %p2061_p4 = pneg %p2060_p2  ;;  %p2067_p11 = por %p2066_p3, %p2065_p1 }
  0x8d   : > { %p2068_p10 = pnand %p2067_p11, %p2061_p4 }
  0x8f   : > { %2071 = shalt.err (!%p2068_p10)
}
  0x90   : > { %p2716_p13 = scmp.ne.s32.totalorder %s2705_s16, 0  ;;  %s322_s29 = scalar_lea.vmem [#allocation10], %s2360_s13 }
  0x91   : > { %s329_s1 = sshll.u32 %s322_s29, 4  ;;  %s2072_s20 = scalar_lea.hbm %s2451_s10, 128  ;;  %s330_s1 = int_to_ptr.vmem [resolvable:$true] %s329_s1 }
  0x92   : > { %1840 = dma.hbm_to_vmem [thread:$0]  (!%p2716_p13), %s2442_s12, 128, %s2445_s17, %s282_s15  }
  0x93   : > { %p2073_p6 = scmp.ne.s32.totalorder %s2451_s10, %s2072_s20  ;;  %s2077_s14 = scalar_lea.hbm %s2665_s2, 256 }
  0x94   : > { %p2078_p0 = scmp.lt.u32.totalorder %s2451_s10, %s2665_s2  ;;  %p2079_p5 = scmp.lt.u32.totalorder %s2077_s14, %s2072_s20 }
  0x95   : > { %p2075_p8 = pnand %p2073_p6, %p2715_p7  ;;  %p2081_p2 = scmp.lt.u32.totalorder %s2072_s20, %s2451_s10 }
  0x96   : > { %p2080_p9 = por %p2079_p5, %p2078_p0 }
  0x97   : > { %p2076_p12 = pneg %p2075_p8 }
  0x98   : > { %p2082_p4 = por %p2081_p2, %p2080_p9 }
  0x9a   : > { %p2083_p1 = pnand %p2082_p4, %p2076_p12 }
  0x9c   : > { %2086 = shalt.err (!%p2083_p1)
}
  0x9d   : > { %s2087_s13 = scalar_lea.vmem %s330_s1, 128  ;;  %s2200_s12 = smov [#allocation10]  }
  0x9e   : > { %p2088_p3 = scmp.ne.s32.totalorder %s330_s1, %s2087_s13  ;;  %s2092_s17 = sshll.u32 %s2200_s12, 4  ;;  %s2093_s17 = int_to_ptr.vmem [resolvable:$false] %s2092_s17 }
  0x9f   : > { %s2094_s15 = scalar_lea.vmem %s2093_s17, 256  ;;  %p2095_p6 = scmp.lt.s32.totalorder %s330_s1, %s2093_s17 }
  0xa0   : > { %p2090_p11 = pnand %p2088_p3, %p2715_p7  ;;  %p2096_p8 = scmp.lt.s32.totalorder %s2094_s15, %s2087_s13 }
  0xa2   : > { %p2091_p10 = pneg %p2090_p11  ;;  %p2097_p13 = por %p2096_p8, %p2095_p6 }
  0xa4   : > { %p2098_p0 = pnand %p2097_p13, %p2091_p10 }
  0xa6   : > { %2101 = shalt.err (!%p2098_p0)
}
  0xa7   : > { %p2717_p5 = scmp.ne.s32.totalorder %s2705_s16, 0  ;;  %p2718_p12 = scmp.ne.s32.totalorder %s2698_s11, 0 }
  0xa8   : > { %s2498_s8 = sand.u32 (!%p2718_p12), 1, %s2176_s25   ;;  %p2719_p7 = scmp.ne.s32.totalorder (!%p2718_p12), %s2695_s9, 0 }
  0xa9   : > { %1846 = dma.hbm_to_vmem [thread:$0]  (!%p2717_p5), %s2451_s10, 128, %s330_s1, %s2384_s28  }
  0xaa   : > { %338 = sbr.rel (%p2718_p12) target bundleno = 1855 (0x73f), region = 48  ;;  %s2501_s3 = sshll.u32 (!%p2718_p12), %s2498_s8, 3 }
  0xab   : > { %s341_s5 = scalar_lea.sflag (!%p2718_p12), [#allocation6], %s2498_s8  ;;  %s344_s29 = scalar_lea.vmem (!%p2718_p12), [#allocation5], %s2501_s3 }
  0xb1   : > { %2155 = dma.done.wait (%p2719_p7), %s341_s5, 128  }
  0xb2   : > { %2157 = vsyncadd (%p2719_p7), %s341_s5, 4294967168  ;;  %s349_s28 = sand.u32 1, %s2284_s30   ;;  %s353_s16 = scalar_lea.vmem [#allocation8], %s2501_s3 }
  0xb3   : > { %s350_s11 = scalar_lea.sflag [#allocation9], %s349_s28 }
  0xb4   : > { %2159 = dma.done.wait (%p2719_p7), %s350_s11, 256  }
  0xb5   : > { %2161 = vsyncadd (%p2719_p7), %s350_s11, 4294967040  ;;  %s362_s10 = scalar_lea.vmem [#allocation10], %s2501_s3  ;;  %p2720_p13 = scmp.eq.s32.totalorder %s2284_s30, 0 }
  0xb7   : > { %2163 = dma.done.wait (%p2720_p13), [#allocation12], 1024   ;;  %p2721_p9 = pmov %p2720_p13 }
  0xb8   : > { %v2201_v0 = vmov 0.0|0.0   ;;  %vm2202_vm0 = vmmov 0   ;;  %v2203_v1 = vmov 0.0   ;;  %v417_v2 = vld [vmem:[#allocation11] sm:$0xff]  ;;  %v418_v3 = vld [vmem:[#allocation11 + $0x8] sm:$0xff]  ;;  %v419_v4 = vld [vmem:[#allocation11 + $0x10] sm:$0xff] }
  0xb9   : > { %2165 = vsyncadd (%p2721_p9), [#allocation12], 4294966272  ;;  %1790 = vmatprep.subr.bf16.mxu0 %v2201_v0  ;;  %1796 = vmatprep.subr.bf16.mxu1 %v2201_v0  ;;  %v1920_v5 = vpack.i.bf16 %v418_v3, %v417_v2  ;;  %v420_v6 = vld [vmem:[#allocation11 + $0x18] sm:$0xff]  ;;  %v1803_v7 = vpack.c.bf16 %v418_v3, %v417_v2  ;;  %s2204_s30 = smov 96   ;;  %s2205_s20 = smov 64   ;;  %v415_v22 = vld [vmem:[%s353_s16] sm:$0xff] }
  0xba   : > { %1714 = vmatprep.mubr.msk.f32.mxu0 %vm2202_vm0, %v2203_v1  ;;  %1725 = vmatprep.mubr.msk.f32.mxu1 %vm2202_vm0, %v2203_v1  ;;  %v1925_v8 = vpack.i.bf16 %v420_v6, %v419_v4  ;;  %v1806_v9 = vpack.c.bf16 %v420_v6, %v419_v4  ;;  %v1647_v10 = vld [vmem:[%s2667_s4] ss:$0 sm:$0xff]  ;;  %vm446_vm1 = vcmask 261120   ;;  %vm698_vm2 = vcmask 64512   ;;  %s2206_s23 = smov 120   ;;  %s2207_s18 = smov 112  }
  0xbb   : > { %1921 = vrot.lane.b32.xlu0 %v1920_v5, %s2204_s30  ;;  %1931 = vrot.lane.b32.xlu1 %v1920_v5, %s2205_s20  ;;  %v610_v28 = vld [vmem:[%s344_s29] sm:$0xff]  ;;  %s2208_s14 = smov 104   ;;  %s2209_s22 = smov 8   ;;  %vm1033_vm3 = vcmask 130112   ;;  %vm1208_vm4 = vcmask 195712   ;;  %vm1383_vm5 = vcmask 261312  }
  0xbc   : > { %v416_v29 = vld [vmem:[%s362_s10] sm:$0xff]  ;;  %s2210_s21 = smov 16   ;;  %s2211_s13 = smov 24  }
  0xbd   : > { %s1667_s15 = sshll.u32 %s2184_s27, 7  ;;  %s410_s5 = scalar_lea.vmem [#allocation14], %s2501_s3 }
  0xbe   : > { %s1486_s29 = sshll.u32 %s410_s5, 4  ;;  %s2613_s16 = scalar_lea.hbm %s2670_s7, %s1667_s15  ;;  %s2615_s29 = int_to_ptr.vmem [resolvable:$true] %s1486_s29 }
  0xbf   : > { %1926 = vrot.lane.b32.xlu0 %v1925_v8, %s2204_s30  ;;  %1936 = vrot.lane.b32.xlu1 %v1925_v8, %s2205_s20  ;;  %s1472_s10 = scalar_lea.sflag [#allocation7], %s2498_s8  ;;  %p2722_p4 = scmp.ne.s32.totalorder %s2703_s19, 0 }
  0xc0   : > { %s2212_s27 = smov [#allocation14]  }
  0xc1   : > { %s2106_s3 = sshll.u32 %s2212_s27, 4  ;;  %s2107_s3 = int_to_ptr.vmem [resolvable:$false] %s2106_s3 }
  0xc2   : > { %s2108_s9 = scalar_lea.vmem %s2107_s3, 256  ;;  %p2109_p11 = scmp.lt.s32.totalorder %s2615_s29, %s2107_s3 }
  0xc3   : > { %443 = vrot.lane.b32.xlu0 %v1647_v10, %s2204_s30  ;;  %s2102_s30 = scalar_lea.vmem %s2615_s29, 128 }
  0xc4   : > { %p2103_p2 = scmp.ne.s32.totalorder %s2615_s29, %s2102_s30  ;;  %p2110_p10 = scmp.lt.s32.totalorder %s2108_s9, %s2102_s30 }
  0xc6   : > { %p2104_p1 = pnand %p2103_p2, %p2722_p4  ;;  %p2111_p6 = por %p2110_p10, %p2109_p11 }
  0xc7   : > { %532 = vrot.lane.b32.xlu0 %v1647_v10, %s2205_s20 }
  0xc8   : > { %p2105_p3 = pneg %p2104_p1 }
  0xca   : > { %p2112_p8 = pnand %p2111_p6, %p2105_p3 }
 0x12d   : > { %v1922_v11 = vpop.permute.xlu0 %1921  ;;  %v1932_v19 = vpop.permute.xlu1 %1931 }
 0x12e   : > { %v1924_v12 = vunpack.i.h.bf16 %v1922_v11  ;;  %v1923_v13 = vunpack.i.l.bf16 %v1922_v11  ;;  %v1934_v20 = vunpack.i.h.bf16 %v1932_v19  ;;  %v1933_v21 = vunpack.i.l.bf16 %v1932_v19 }
 0x130   : > { %v1791_v14 = vpack.c.bf16 %v1924_v12, %v1923_v13  ;;  %v1797_v23 = vpack.c.bf16 %v1934_v20, %v1933_v21 }
 0x131   : > { %v1927_v15 = vpop.permute.xlu0 %1926  ;;  %v1937_v24 = vpop.permute.xlu1 %1936 }
 0x132   : > { %v1929_v16 = vunpack.i.h.bf16 %v1927_v15  ;;  %v1928_v17 = vunpack.i.l.bf16 %v1927_v15  ;;  %1792 = vmatpush3.bf16.msra.mxu0 %v1791_v14  ;;  %v1939_v25 = vunpack.i.h.bf16 %v1937_v24  ;;  %v1938_v26 = vunpack.i.l.bf16 %v1937_v24  ;;  %1798 = vmatpush3.bf16.msra.mxu1 %v1797_v23 }
 0x133   : > { %1793 = vmatprep.subr.bf16.mxu0 %v2201_v0  ;;  %1799 = vmatprep.subr.bf16.mxu1 %v2201_v0 }
 0x134   : > { %v1794_v18 = vpack.c.bf16 %v1929_v16, %v1928_v17  ;;  %v1800_v27 = vpack.c.bf16 %v1939_v25, %v1938_v26 }
 0x135   : > { %v444_v30 = vpop.permute.xlu0 %443 }
 0x136   : > { %1795 = vmatpush3.bf16.msra.mxu0 %v1794_v18  ;;  %1801 = vmatpush3.bf16.msra.mxu1 %v1800_v27 }
 0x137   : > { %1802 = vmatprep.subr.bf16.mxu0 %v2201_v0  ;;  %1739 = vmatprep.subr.mxu1 %v2203_v1 }
 0x139   : > { %1715 = vmatmul.mubr.msk.f32.vlgmr.msra.gmra.mrb[0].mxu0 %vm446_vm1, %v415_v22  ;;  %1726 = vmatmul.mubr.msk.f32.vlgmr.msra.gmra.mrb[0].mxu1 %vm446_vm1, %v416_v29  ;;  %v533_v38 = vpop.permute.xlu0 %532 }
 0x13a   : > { %1804 = vmatpush3.bf16.msra.mxu0 %v1803_v7  ;;  %1736 = vmatprep.mubr.msk.f32.mxu0 %vm2202_vm0, %v2203_v1 }
 0x13b   : > { %1805 = vmatprep.subr.bf16.mxu0 %v2201_v0  ;;  %1741 = vmatprep.mubr.msk.f32.mxu1 %vm2202_vm0, %v2203_v1 }
 0x13e   : > { %1807 = vmatpush3.bf16.msra.mxu0 %v1806_v9 }
 0x13f   : > { %1759 = vmatprep.subr.mxu0 %v2203_v1 }
 0x141   : > { %1737 = vmatmul.mubr.msk.f32.vlgmr.msra.gmra.mrb[2].mxu0 %vm446_vm1, %v610_v28 }
 0x142   : > { %1761 = vmatprep.mubr.msk.f32.mxu0 %vm2202_vm0, %v2203_v1 }
 0x20c   : > { %v516_v31 = vpop.f32.mrb[0].mxu0  ;;  %v604_v39 = vpop.f32.mrb[0].mxu1 }
 0x20d   : > { %v517_v32 = vadd.f32 %v516_v31, %v444_v30  ;;  %v1716_v33 = vpop.f32.mrb[1].mxu0  ;;  %v605_v40 = vadd.f32 %v604_v39, %v533_v38  ;;  %v1727_v41 = vpop.f32.mrb[1].mxu1  ;;  %v1386_v30 = vld [vmem:[#allocation13] sm:$0xff]  ;;  %v1387_v31 = vld [vmem:[#allocation13 + $0x8] sm:$0xff] }
 0x20e   : > { %v1389_v33 = vld [vmem:[#allocation13 + $0x18] sm:$0xff] }
 0x20f   : > { %608 = vst.msk [vmem:[#allocation2] sm:$0xff] %vm446_vm1, %v517_v32  ;;  %609 = vst.msk [vmem:[#allocation3] sm:$0xff] %vm446_vm1, %v605_v40  ;;  %v1388_v32 = vld [vmem:[#allocation13 + $0x10] sm:$0xff] }
 0x214   : > { %v692_v34 = vpop.f32.mrb[2].mxu0 }
 0x215   : > { %v1738_v35 = vpop.f32.mrb[3].mxu0  ;;  %v693_v37 = vadd.f32 %v1647_v10, %v692_v34 }
 0x216   : > { %v860_v36 = vld [vmem:[#allocation2] sm:$0xff]  ;;  %v697_v42 = vld [vmem:[#allocation3] sm:$0xff] }
 0x217   : > { %865 = vrot.lane.b32.xlu0 %v860_v36, %s2206_s23  ;;  %1740 = vmatpush3.xpose.msk.msra.mxu1 %vm698_vm2, %v860_v36 }
 0x218   : > { %1744 = vmatprep.subr.mxu1 %v2203_v1 }
 0x21a   : > { %1742 = vmatmul.mubr.msk.f32.vlgmr.msra.gmra.mrb[2].mxu1 %vm698_vm2, %v693_v37 }
 0x21b   : > { %862 = vrot.lane.b32.xlu0 %v693_v37, %s2206_s23  ;;  %1746 = vmatprep.mubr.msk.f32.mxu1 %vm2202_vm0, %v2203_v1 }
 0x21c   : > { %1745 = vmatpush3.msra.mxu1 %v697_v42 }
 0x21d   : > { %1749 = vmatprep.subr.mxu1 %v2203_v1 }
 0x21f   : > { %1040 = vrot.lane.b32.xlu0 %v860_v36, %s2207_s18 }
 0x223   : > { %1037 = vrot.lane.b32.xlu0 %v693_v37, %s2207_s18 }
 0x227   : > { %1215 = vrot.lane.b32.xlu0 %v860_v36, %s2208_s14  ;;  %v1812_v36 = vpack.c.bf16 %v1389_v33, %v1388_v32 }
 0x22b   : > { %1212 = vrot.lane.b32.xlu0 %v693_v37, %s2208_s14 }
 0x289   : > { %v866_v43 = vpop.permute.xlu0 %865 }
 0x28d   : > { %v863_v44 = vpop.permute.xlu0 %862 }
 0x291   : > { %v1041_v45 = vpop.permute.xlu0 %1040 }
 0x292   : > { %1760 = vmatpush3.xpose.msk.msra.mxu0 %vm698_vm2, %v1041_v45 }
 0x293   : > { %1769 = vmatprep.subr.mxu0 %v2203_v1 }
 0x295   : > { %v1038_v46 = vpop.permute.xlu0 %1037 }
 0x296   : > { %1762 = vmatmul.mubr.msk.f32.vlgmr.msra.gmra.mrb[4].mxu0 %vm698_vm2, %v1038_v46 }
 0x297   : > { %1771 = vmatprep.mubr.msk.f32.mxu0 %vm2202_vm0, %v2203_v1 }
 0x299   : > { %v1216_v47 = vpop.permute.xlu0 %1215 }
 0x29a   : > { %1770 = vmatpush3.xpose.msk.msra.mxu0 %vm698_vm2, %v1216_v47 }
 0x29b   : > { %1808 = vmatprep.subr.bf16.mxu0 %v2201_v0 }
 0x29d   : > { %v1213_v48 = vpop.permute.xlu0 %1212 }
 0x29e   : > { %1772 = vmatmul.mubr.msk.f32.vlgmr.msra.gmra.mrb[6].mxu0 %vm698_vm2, %v1213_v48 }
 0x29f   : > { %1787 = vmatprep.mubr.msk.f32.mxu0 %vm2202_vm0, %v2203_v1 }
 0x2ed   : > { %v771_v49 = vpop.f32.mrb[2].mxu1 }
 0x2ee   : > { %v1743_v50 = vpop.f32.mrb[3].mxu1  ;;  %v775_v51 = vsel %vm698_vm2, %v771_v49, -inf }
 0x2ef   : > { %776 = vmax.xlane.f32.xlu1 %v775_v51  ;;  %v1664_v50 = vld [vmem:[%s2669_s6] ss:$0 sm:$0xff] }
 0x369   : > { %v1112_v52 = vpop.f32.mrb[4].mxu0 }
 0x36a   : > { %v1763_v53 = vpop.f32.mrb[5].mxu0  ;;  %v1116_v54 = vsel %vm698_vm2, %v1112_v52, -inf }
 0x36b   : > { %1117 = vmax.xlane.f32.xlu1 %v1116_v54 }
 0x371   : > { %v1287_v55 = vpop.f32.mrb[6].mxu0 }
 0x372   : > { %v1773_v56 = vpop.f32.mrb[7].mxu0  ;;  %v1291_v57 = vsel %vm698_vm2, %v1287_v55, -inf }
 0x373   : > { %1292 = vmax.xlane.f32.xlu1 %v1291_v57 }
 0x37c   : > { %v777_v58 = vpop.xlane.xlu1 %776 }
 0x37d   : > { %v778_v59 = vsub.f32 %v771_v49, %v777_v58 }
 0x37f   : > { %v779_v60 = vmul.f32 1.442695, %v778_v59 }
 0x381   : > { %1940 = vpow2.f32 %v779_v60 }
 0x384   : > { %951 = vrot.lane.b32.xlu1 %v697_v42, %s2206_s23 }
 0x388   : > { %1126 = vrot.lane.b32.xlu1 %v697_v42, %s2207_s18 }
 0x38b   : > { %v1941_v61 = vpop.eup %1940 }
 0x38c   : > { %1747 = vmatmul.mubr.msk.f32.vlgmr.msra.gmra.mrb[4].mxu1 %vm698_vm2, %v1941_v61  ;;  %v781_v23 = vsel %vm698_vm2, %v1941_v61, 0.0 }
 0x38d   : > { %1750 = vmatpush3.xpose.msk.msra.mxu1 %vm698_vm2, %v866_v43  ;;  %1751 = vmatprep.mubr.msk.f32.mxu1 %vm2202_vm0, %v2203_v1 }
 0x38e   : > { %1754 = vmatprep.subr.mxu1 %v2203_v1 }
 0x390   : > { %1752 = vmatmul.mubr.msk.f32.vlgmr.msra.gmra.mrb[6].mxu1 %vm698_vm2, %v863_v44 }
 0x391   : > { %1756 = vmatprep.mubr.msk.f32.mxu1 %vm2202_vm0, %v2203_v1 }
 0x3f8   : > { %v1118_v62 = vpop.xlane.xlu1 %1117 }
 0x3f9   : > { %v1119_v63 = vsub.f32 %v1112_v52, %v1118_v62 }
 0x3fb   : > { %v1120_v10 = vmul.f32 1.442695, %v1119_v63 }
 0x3fd   : > { %1942 = vpow2.f32 %v1120_v10 }
 0x400   : > { %v1293_v2 = vpop.xlane.xlu1 %1292 }
 0x401   : > { %v1294_v3 = vsub.f32 %v1287_v55, %v1293_v2 }
 0x403   : > { %v1295_v15 = vmul.f32 1.442695, %v1294_v3 }
 0x404   : > { %v952_v4 = vpop.permute.xlu1 %951 }
 0x405   : > { %1755 = vmatpush3.msra.mxu1 %v952_v4 }
 0x406   : > { %1764 = vmatprep.subr.mxu1 %v2203_v1 }
 0x407   : > { %v1943_v11 = vpop.eup %1942 }
 0x408   : > { %v1122_v12 = vsel %vm698_vm2, %v1943_v11, 0.0  ;;  %v1127_v18 = vpop.permute.xlu1 %1126 }
 0x45f   : > { %v853_v5 = vpop.f32.mrb[4].mxu1 }
 0x460   : > { %v1748_v6 = vpop.f32.mrb[5].mxu1 }
 0x463   : > { %v937_v7 = vpop.f32.mrb[6].mxu1 }
 0x464   : > { %v1753_v8 = vpop.f32.mrb[7].mxu1  ;;  %v941_v9 = vsel %vm698_vm2, %v937_v7, -inf }
 0x465   : > { %942 = vmax.xlane.f32.xlu0 %v941_v9 }
 0x47b   : > { %1301 = vrot.lane.b32.xlu0 %v697_v42, %s2208_s14 }
 0x49a   : > { %1123 = vadd.xlane.f32.xlu0 %v1122_v12 }
 0x4f2   : > { %v943_v13 = vpop.xlane.xlu0 %942 }
 0x4f3   : > { %v944_v14 = vsub.f32 %v937_v7, %v943_v13 }
 0x4f5   : > { %v945_v16 = vmul.f32 1.442695, %v944_v14 }
 0x4f6   : > { %v1302_v21 = vpop.permute.xlu0 %1301 }
 0x4f7   : > { %1944 = vpow2.f32 %v945_v16 }
 0x4f8   : > { %1946 = vpow2.f32 %v1295_v15 }
 0x501   : > { %v1945_v17 = vpop.eup %1944 }
 0x502   : > { %1757 = vmatmul.mubr.msk.f32.vlgmr.msra.gmra.mrb[8].mxu1 %vm698_vm2, %v1945_v17  ;;  %v947_v19 = vsel %vm698_vm2, %v1945_v17, 0.0  ;;  %v1947_v20 = vpop.eup %1946 }
 0x503   : > { %1765 = vmatpush3.msra.mxu1 %v1127_v18  ;;  %948 = vadd.xlane.f32.xlu1 %v947_v19  ;;  %v1297_v22 = vsel %vm698_vm2, %v1947_v20, 0.0 }
 0x504   : > { %1766 = vmatprep.mubr.msk.f32.mxu1 %vm2202_vm0, %v2203_v1  ;;  %1774 = vmatprep.subr.mxu1 %v2203_v1 }
 0x506   : > { %1767 = vmatmul.mubr.msk.f32.vlgmr.msra.gmra.mrb[10].mxu1 %vm698_vm2, %v1943_v11 }
 0x507   : > { %1775 = vmatpush3.msra.mxu1 %v1302_v21  ;;  %1298 = vadd.xlane.f32.xlu1 %v1297_v22 }
 0x508   : > { %1776 = vmatprep.mubr.msk.f32.mxu1 %vm2202_vm0, %v2203_v1  ;;  %v1809_v1 = vpack.c.bf16 %v1387_v31, %v1386_v30 }
 0x50a   : > { %1777 = vmatmul.mubr.msk.f32.vlgmr.msra.gmra.mrb[12].mxu1 %vm698_vm2, %v1947_v20  ;;  %1810 = vmatpush3.bf16.msra.mxu0 %v1809_v1 }
 0x50b   : > { %782 = vadd.xlane.f32.xlu1 %v781_v23  ;;  %1811 = vmatprep.subr.bf16.mxu0 %v2201_v0 }
 0x50e   : > { %1813 = vmatpush3.bf16.msra.mxu0 %v1812_v36 }
 0x527   : > { %v1124_v29 = vpop.xlane.xlu0 %1123 }
 0x590   : > { %v949_v24 = vpop.xlane.xlu1 %948 }
 0x594   : > { %v1299_v25 = vpop.xlane.xlu1 %1298 }
 0x598   : > { %v783_v26 = vpop.xlane.xlu1 %782 }
 0x599   : > { %1948 = vrcp.f32 %v783_v26 }
 0x59a   : > { %1950 = vrcp.f32 %v949_v24 }
 0x59b   : > { %1952 = vrcp.f32 %v1124_v29 }
 0x59c   : > { %1954 = vrcp.f32 %v1299_v25 }
 0x5a3   : > { %v1949_v27 = vpop.eup %1948 }
 0x5a4   : > { %v858_v28 = vmul.f32 %v1949_v27, %v853_v5  ;;  %v1951_v34 = vpop.eup %1950 }
 0x5a5   : > { %v1953_v39 = vpop.eup %1952 }
 0x5a6   : > { %859 = vst.msk [vmem:[#allocation4] sm:$0xff] %vm698_vm2, %v858_v28  ;;  %v1955_v43 = vpop.eup %1954 }
 0x5d5   : > { %v1023_v35 = vpop.f32.mrb[8].mxu1 }
 0x5d6   : > { %v1028_v37 = vmul.f32 %v1951_v34, %v1023_v35  ;;  %v1758_v38 = vpop.f32.mrb[9].mxu1 }
 0x5d8   : > { %1030 = vrot.lane.b32.xlu1 %v1028_v37, %s2209_s22 }
 0x5d9   : > { %v1198_v40 = vpop.f32.mrb[10].mxu1 }
 0x5da   : > { %v1203_v41 = vmul.f32 %v1953_v39, %v1198_v40  ;;  %v1768_v42 = vpop.f32.mrb[11].mxu1 }
 0x5dc   : > { %1205 = vrot.lane.b32.xlu0 %v1203_v41, %s2210_s21 }
 0x5dd   : > { %v1373_v44 = vpop.f32.mrb[12].mxu1 }
 0x5de   : > { %v1378_v45 = vmul.f32 %v1955_v43, %v1373_v44  ;;  %v1778_v46 = vpop.f32.mrb[13].mxu1 }
 0x5e0   : > { %1380 = vrot.lane.b32.xlu1 %v1378_v45, %s2211_s13 }
 0x64a   : > { %v1031_v47 = vpop.permute.xlu1 %1030 }
 0x64b   : > { %1034 = vst.msk [vmem:[#allocation4] sm:$0xff] %vm1033_vm3, %v1031_v47 }
 0x64e   : > { %v1206_v0 = vpop.permute.xlu0 %1205 }
 0x64f   : > { %1209 = vst.msk [vmem:[#allocation4] sm:$0xff] %vm1208_vm4, %v1206_v0 }
 0x652   : > { %v1381_v48 = vpop.permute.xlu1 %1380 }
 0x653   : > { %1384 = vst.msk [vmem:[#allocation4] sm:$0xff] %vm1383_vm5, %v1381_v48 }
 0x65a   : > { %v1385_v49 = vld [vmem:[#allocation4] sm:$0xff] }
 0x65b   : > { %1788 = vmatmul.mubr.msk.f32.vlgmr.msra.gmra.mrb[8].mxu0 %vm446_vm1, %v1385_v49 }
 0x72e   : > { %v1466_v51 = vpop.f32.mrb[8].mxu0 }
 0x72f   : > { %v1467_v52 = vadd.f32 %v1664_v50, %v1466_v51  ;;  %v1789_v53 = vpop.f32.mrb[9].mxu0 }
 0x731   : > { %1470 = vst.msk [vmem:[%s410_s5] sm:$0xff] %vm446_vm1, %v1467_v52 }
 0x732   : > { %2115 = shalt.err (!%p2112_p8)
}
 0x733   : > { %s2116_s8 = scalar_lea.hbm %s2613_s16, 128  ;;  %s2120_s23 = scalar_lea.hbm %s2670_s7, 256 }
 0x734   : > { %p2117_p0 = scmp.ne.s32.totalorder %s2613_s16, %s2116_s8  ;;  %p2121_p7 = scmp.lt.u32.totalorder %s2613_s16, %s2670_s7 }
 0x735   : > { %p2122_p13 = scmp.lt.u32.totalorder %s2120_s23, %s2116_s8  ;;  %p2124_p2 = scmp.lt.u32.totalorder %s2116_s8, %s2613_s16 }
 0x736   : > { %p2118_p5 = pnand %p2117_p0, %p2722_p4 }
 0x737   : > { %p2123_p9 = por %p2122_p13, %p2121_p7 }
 0x738   : > { %p2119_p12 = pneg %p2118_p5 }
 0x739   : > { %p2125_p1 = por %p2124_p2, %p2123_p9 }
 0x73b   : > { %p2126_p3 = pnand %p2125_p1, %p2119_p12 }
 0x73d   : > { %2129 = shalt.err (!%p2126_p3)
}
 0x73e   : > { %1828 = dma.vmem_to_hbm [thread:$0]  (%p2722_p4), %s2615_s29, 128, %s2613_s16, %s1472_s10  }
 0x73f PF: > { %s2723_s22 = sld [smem:[#allocation21_spill]]  ;;  %s2724_s21 = sld [smem:[#allocation20_spill]] }
 0x740   : > { %s1498_s13 = sand.u32 1, %s2172_s24  }
 0x741   : > { %s1499_s12 = scalar_lea.sflag [#allocation7], %s1498_s13 }
 0x745   : > { %p2725_p11 = scmp.ne.s32.totalorder %s2723_s22, 0  ;;  %p2726_p10 = scmp.ge.s32.totalorder %s2724_s21, 2 }
 0x747   : > { %p1848_p6 = pnand %p2726_p10, %p2725_p11 }
 0x749   : > { %2167 = dma.done.wait (!%p1848_p6), %s1499_s12, 128  }
 0x74a   : > { %2169 = vsyncadd (!%p1848_p6), %s1499_s12, 4294967168  ;;  %s27_s29 = sadd.s32 1, %s2724_s21   ;;  %s2727_s19 = sld [smem:[#allocation23_spill]] }
 0x74b   : > { %p24_p8 = scmp.ge.s32.totalorder %s27_s29, 4   ;;  %s2728_s27 = sld [smem:[#allocation19_spill]] }
 0x74c   : > { %s2729_s28 = sld [smem:[#allocation22_spill]]  ;;  %s2730_s24 = smov %s2176_s25 }
 0x74d   : > { %s2731_s25 = smov %s2180_s26  ;;  %26 = sbr.rel (!%p24_p8) target bundleno = 13 (0xd), region = 129 }
 0x750   : > { %s2732_s26 = smov %s2727_s19 }
 0x754   :  { %1504 = vsyncpa [#allocation6], 1 }
 0x755   :  { %1506 = vsyncpa [#allocation6 + $0x1], 1 }
 0x756   :  { %1507 = vsyncpa [#allocation9], 1 }
 0x757   :  { %1509 = vsyncpa [#allocation9 + $0x1], 1 }
 0x758   :  { %1510 = vsyncpa [#allocation12], 1 }
 0x759   :  { %1511 = vsyncpa [#allocation7], 1 }
 0x75a   :  { %1513 = vsyncpa [#allocation7 + $0x1], 1 }

</bundles_post_ra>
